<compile_context>
chip_gen: v7x
topology: tpu7x:2x2x1
jax: 0.10.0
libtpu: 0.0.40
codegen_flags: <defaults>
</compile_context>

<pallas_src>
import functools
import numpy as np
import jax
import jax.numpy as jnp
from jax import lax
from jax.experimental import pallas as pl
from jax.experimental.pallas import tpu as pltpu

_MASK_VALUE = -1e30
_VMEM_LIMIT = 64 * 1024 * 1024


def _choose_tile(dim, target, unit):
    """Largest tile <= target that is a multiple of `unit` and evenly divides
    `dim`; falls back to the full dimension (always layout-legal)."""
    if dim <= target:
        return dim
    t = (min(target, dim) // unit) * unit
    while t >= unit:
        if dim % t == 0:
            return t
        t -= unit
    return dim


# -----------------------------------------------------------------------------
# Tiled linear (matmul + bias) kernel: bf16 operands, f32 accumulation
# -----------------------------------------------------------------------------
def _linear_kernel(x_ref, w_ref, b_ref, o_ref, acc_ref):
    @pl.when(pl.program_id(2) == 0)
    def _():
        acc_ref[...] = jnp.zeros_like(acc_ref)

    acc_ref[...] += jnp.dot(x_ref[...], w_ref[...],
                            preferred_element_type=jnp.float32)

    @pl.when(pl.program_id(2) == pl.num_programs(2) - 1)
    def _():
        o_ref[...] = (acc_ref[...] + b_ref[...]).astype(o_ref.dtype)


def pallas_linear(x, w, b, out_dtype=jnp.bfloat16, tm=256, tn=256, tk=512):
    M, K = x.shape
    K2, N = w.shape
    assert K == K2
    tm = _choose_tile(M, tm, 8)
    tn = _choose_tile(N, tn, 128)
    tk = _choose_tile(K, tk, 128)
    x = x.astype(jnp.bfloat16)
    w = w.astype(jnp.bfloat16)
    b2 = b.reshape(1, N).astype(jnp.float32)
    grid = (M // tm, N // tn, K // tk)
    return pl.pallas_call(
        _linear_kernel,
        out_shape=jax.ShapeDtypeStruct((M, N), out_dtype),
        grid=grid,
        in_specs=[
            pl.BlockSpec((tm, tk), lambda i, j, k: (i, k)),
            pl.BlockSpec((tk, tn), lambda i, j, k: (k, j)),
            pl.BlockSpec((1, tn), lambda i, j, k: (0, j)),
        ],
        out_specs=pl.BlockSpec((tm, tn), lambda i, j, k: (i, j)),
        scratch_shapes=[pltpu.VMEM((tm, tn), jnp.float32)],
        compiler_params=pltpu.CompilerParams(
            dimension_semantics=("parallel", "parallel", "arbitrary"),
            vmem_limit_bytes=_VMEM_LIMIT),
    )(x, w, b2)


# -----------------------------------------------------------------------------
# Text causal self-attention (all heads of one batch element per grid step)
# -----------------------------------------------------------------------------
def _text_attn_kernel(q_ref, k_ref, v_ref, o_ref):
    # q/k/v blocks: (1, T, H, d) bf16 (q already pre-scaled via folded weights)
    q = q_ref[0].transpose(1, 0, 2)  # (H, T, d)
    k = k_ref[0].transpose(1, 0, 2)
    v = v_ref[0].transpose(1, 0, 2)
    H, T, d = q.shape

    dots = jnp.einsum("hid,hjd->hij", q, k,
                      preferred_element_type=jnp.float32)        # (H, T, T)
    row = lax.broadcasted_iota(jnp.int32, (T, T), 0)
    col = lax.broadcasted_iota(jnp.int32, (T, T), 1)
    dots = jnp.where((col > row)[None], _MASK_VALUE, dots)        # causal

    m = jnp.max(dots, axis=-1, keepdims=True)
    p = jnp.exp(dots - m)
    denom = jnp.sum(p, axis=-1, keepdims=True)
    out = jnp.einsum("hij,hjd->hid", p.astype(v.dtype), v,
                     preferred_element_type=jnp.float32)          # (H, T, d)
    out = out * pl.reciprocal(denom, approx=True)

    # lane-dense write, already in final 'n (h d)' layout
    o_ref[0] = out.transpose(1, 0, 2).reshape(T, H * d).astype(o_ref.dtype)


def text_attention(q, k, v, text_len):
    b, N, H, d = q.shape
    inner = H * d
    qkv_spec = pl.BlockSpec((1, text_len, H, d), lambda i: (i, 0, 0, 0))
    out_spec = pl.BlockSpec((1, text_len, inner), lambda i: (i, 0, 0))
    return pl.pallas_call(
        _text_attn_kernel,
        out_shape=jax.ShapeDtypeStruct((b, text_len, inner), jnp.bfloat16),
        grid=(b,),
        in_specs=[qkv_spec, qkv_spec, qkv_spec],
        out_specs=out_spec,
        compiler_params=pltpu.CompilerParams(
            dimension_semantics=("parallel",),
            vmem_limit_bytes=_VMEM_LIMIT),
    )(q, k, v)


# -----------------------------------------------------------------------------
# Axial image attention (image->image causal along axis, plus image->text with
# the text key-padding mask), fused joint softmax. One batch element per step.
# -----------------------------------------------------------------------------
def _image_attn_kernel(q_ref, k_ref, v_ref, m_ref, o_ref, *,
                       text_len, img_size, axis):
    # q/k/v blocks: (1, N, H, d) bf16; mask: (1, 1, T) f32; out: (1, M, H*d)
    q_all = q_ref[0]                        # (N, H, d)
    k_all = k_ref[0]
    v_all = v_ref[0]
    H, d = q_all.shape[1], q_all.shape[2]
    I = img_size
    M = img_size * img_size

    kt = k_all[:text_len].transpose(1, 0, 2)   # (H, T, d)
    vt = v_all[:text_len].transpose(1, 0, 2)
    qi = q_all[text_len:]                      # (M, H, d)
    ki = k_all[text_len:]
    vi = v_all[text_len:]

    def to_axial(t):                           # (M, H, d) -> (H, X, I, d)
        t = t.reshape(img_size, img_size, H, d)
        if axis == 1:                          # 'b (h w) c -> b w h c'
            t = t.transpose(1, 0, 2, 3)
        return t.transpose(2, 0, 1, 3)

    qx = to_axial(qi)
    kx = to_axial(ki)
    vx = to_axial(vi)
    qf = qx.reshape(H, M, d)                   # (x, i)-flattened image queries

    # image -> text : one big (M, d) x (d, T) matmul per head (fills the MXU)
    d_it = jnp.einsum("hmd,htd->hmt", qf, kt,
                      preferred_element_type=jnp.float32)         # (H, M, T)
    tmask = m_ref[0]                                              # (1, T)
    d_it = jnp.where(tmask[None] < 0.5, _MASK_VALUE, d_it)

    # image -> image : causal along the chosen axis
    d_ii = jnp.einsum("hxid,hxjd->hxij", qx, kx,
                      preferred_element_type=jnp.float32)         # (H, X, I, I)
    row = lax.broadcasted_iota(jnp.int32, (I, I), 0)
    col = lax.broadcasted_iota(jnp.int32, (I, I), 1)
    d_ii = jnp.where((col > row)[None, None], _MASK_VALUE, d_ii)
    d_ii = d_ii.reshape(H, M, I)

    # joint softmax over the concatenated [text | image] keys, no concat
    mx = jnp.maximum(jnp.max(d_ii, axis=-1, keepdims=True),
                     jnp.max(d_it, axis=-1, keepdims=True))       # (H, M, 1)
    p_ii = jnp.exp(d_ii - mx)
    p_it = jnp.exp(d_it - mx)
    denom = (jnp.sum(p_ii, axis=-1, keepdims=True)
             + jnp.sum(p_it, axis=-1, keepdims=True))

    out_ii = jnp.einsum("hxij,hxjd->hxid",
                        p_ii.reshape(H, img_size, I, I).astype(vx.dtype), vx,
                        preferred_element_type=jnp.float32).reshape(H, M, d)
    out_it = jnp.einsum("hmt,htd->hmd", p_it.astype(vt.dtype), vt,
                        preferred_element_type=jnp.float32)
    out = (out_ii + out_it) * pl.reciprocal(denom, approx=True)   # (H, M, d)

    if axis == 1:   # back to original sequence order: 'b x n d -> b (n x) d'
        out = out.reshape(H, img_size, img_size, d)
        out = out.transpose(0, 2, 1, 3).reshape(H, M, d)
    # lane-dense write, already in final 'n (h d)' layout
    o_ref[0] = out.transpose(1, 0, 2).reshape(M, H * d).astype(o_ref.dtype)


def image_attention(q, k, v, tmask, *, text_len, img_size, axis):
    b, N, H, d = q.shape
    inner = H * d
    M = img_size * img_size
    qkv_spec = pl.BlockSpec((1, N, H, d), lambda i: (i, 0, 0, 0))
    msk_spec = pl.BlockSpec((1, 1, text_len), lambda i: (i, 0, 0))
    out_spec = pl.BlockSpec((1, M, inner), lambda i: (i, 0, 0))
    kernel = functools.partial(_image_attn_kernel, text_len=text_len,
                               img_size=img_size, axis=axis)
    return pl.pallas_call(
        kernel,
        out_shape=jax.ShapeDtypeStruct((b, M, inner), jnp.bfloat16),
        grid=(b,),
        in_specs=[qkv_spec, qkv_spec, qkv_spec, msk_spec],
        out_specs=out_spec,
        compiler_params=pltpu.CompilerParams(
            dimension_semantics=("parallel",),
            vmem_limit_bytes=_VMEM_LIMIT),
    )(q, k, v, tmask)


# -----------------------------------------------------------------------------
# Forward pass (thin glue in JAX, compute in Pallas)
# -----------------------------------------------------------------------------
def sparse_axial_causal_attention(x, params, *, heads, dim_head, image_size,
                                  seq_len, axis, mask=None):
    assert axis in (0, 1)
    b, n, dim = x.shape
    inner = heads * dim_head
    img_seq_len = image_size ** 2
    text_len = seq_len + 1 - img_seq_len
    padding = seq_len - n + 1
    scale = dim_head ** (-0.5)
    N = seq_len + 1

    if mask is None:
        mask = jnp.ones((b, text_len), dtype=bool)
    mask = mask[:, :text_len]
    mask_f = mask.astype(jnp.float32).reshape(b, 1, text_len)

    # pad the sequence in bf16 (halves HBM traffic vs f32 pad)
    x_pad = jnp.pad(x.astype(jnp.bfloat16), ((0, 0), (0, padding), (0, 0)))
    x2 = x_pad.reshape(b * N, dim)

    # to_qkv has no bias; fold the 1/sqrt(d) query scale into the q weights.
    w_qkv = params["w_qkv"]
    w_q = w_qkv[:, :inner] * scale
    w_k = w_qkv[:, inner:2 * inner]
    w_v = w_qkv[:, 2 * inner:]
    zero_bias = jnp.zeros((inner,), jnp.float32)

    def project(w):
        y = pallas_linear(x2, w, zero_bias, out_dtype=jnp.bfloat16)
        return y.reshape(b, N, heads, dim_head)     # natural 'b n h d' layout

    q = project(w_q)
    k = project(w_k)
    v = project(w_v)
    # TODO(synk): rotary_pos_emb path not implemented (module allows rotary_pos_emb=None).

    out_text = text_attention(q, k, v, text_len)                 # (b, T, inner)
    out_img = image_attention(q, k, v, mask_f, text_len=text_len,
                              img_size=image_size, axis=axis)    # (b, M, inner)

    out = jnp.concatenate([out_text, out_img], axis=1)           # (b, N, inner)

    # to_out linear (+bias); Dropout(p=0.0) is identity at inference.
    out = pallas_linear(out.reshape(b * N, inner), params["w_out"],
                        params["b_out"], out_dtype=jnp.float32)
    return out.reshape(b, N, dim)[:, :n]


# -----------------------------------------------------------------------------
# Pure-JAX reference (mirrors the PyTorch forward) for verification
# -----------------------------------------------------------------------------
def reference_forward(x, params, *, heads, dim_head, image_size, seq_len, axis,
                      mask=None):
    b, n, dim = x.shape
    inner_dim = heads * dim_head
    img_seq_len = image_size ** 2
    text_len = seq_len + 1 - img_seq_len
    padding = seq_len - n + 1
    scale = dim_head ** (-0.5)
    N = seq_len + 1
    BH = b * heads
    mask_value = -jnp.finfo(jnp.float32).max

    if mask is None:
        mask = jnp.ones((b, text_len), dtype=bool)
    mask = mask[:, :text_len]

    xp = jnp.pad(x.astype(jnp.float32), ((0, 0), (0, padding), (0, 0)))
    qkv = xp @ params["w_qkv"]
    q, k, v = jnp.split(qkv, 3, axis=-1)

    def sh(t):
        return (t.reshape(b, N, heads, dim_head)
                 .transpose(0, 2, 1, 3)
                 .reshape(BH, N, dim_head))

    q, k, v = sh(q), sh(k), sh(v)
    q = q * scale
    q_text, q_img = q[:, :text_len], q[:, text_len:]
    k_text, k_img = k[:, :text_len], k[:, text_len:]
    v_text, v_img = v[:, :text_len], v[:, text_len:]

    T = text_len
    dots_text = jnp.einsum("bid,bjd->bij", q_text, k_text)
    cm = jnp.triu(jnp.ones((T, T), dtype=bool), 1)
    dots_text = jnp.where(cm, mask_value, dots_text)
    attn_text = jax.nn.softmax(dots_text, axis=-1)
    out_text = jnp.einsum("bij,bjd->bid", attn_text, v_text)

    def split_axis(t):
        t = t.reshape(BH, image_size, image_size, dim_head)
        if axis == 1:
            t = t.transpose(0, 2, 1, 3)
        return t

    qi, ki, vi = map(split_axis, (q_img, k_img, v_img))
    d_ii = jnp.einsum("bxid,bxjd->bxij", qi, ki)
    d_it = jnp.einsum("bxid,bjd->bxij", qi, k_text)
    dots = jnp.concatenate([d_it, d_ii], axis=-1)

    I = image_size
    causal = jnp.triu(jnp.ones((I, I), dtype=bool), 1)
    tmask = jnp.repeat(mask, heads, axis=0)  # (BH, T)
    full_mask = jnp.concatenate(
        [jnp.broadcast_to(~tmask[:, None, None, :], (BH, I, I, T)),
         jnp.broadcast_to(causal[None, None, :, :], (BH, I, I, I))], axis=-1)
    dots = jnp.where(full_mask, mask_value, dots)
    attn = jax.nn.softmax(dots, axis=-1)
    a_it, a_ii = attn[..., :T], attn[..., T:]
    out_img = (jnp.einsum("bxij,bxjd->bxid", a_ii, vi)
               + jnp.einsum("bxij,bjd->bxid", a_it, v_text))
    if axis == 1:
        out_img = out_img.transpose(0, 2, 1, 3)
    out_img = out_img.reshape(BH, img_seq_len, dim_head)

    out = jnp.concatenate([out_text, out_img], axis=1)
    out = (out.reshape(b, heads, N, dim_head)
              .transpose(0, 2, 1, 3)
              .reshape(b, N, inner_dim))
    out = out @ params["w_out"] + params["b_out"]
    return out[:, :n]


# -----------------------------------------------------------------------------
if __name__ == "__main__":
    key = jax.random.PRNGKey(0)
    kx, kq, ko, kb, km = jax.random.split(key, 5)

    # small, consistent shapes
    b, n, dim = 2, 20, 32
    heads, dim_head = 2, 16
    image_size = 4                               # img_seq_len = 16
    text_len = 8
    seq_len = text_len - 1 + image_size ** 2     # 23 -> padded seq N = 24
    inner_dim = heads * dim_head

    x = jax.random.normal(kx, (b, n, dim), dtype=jnp.float32)
    params = {
        "w_qkv": 0.05 * jax.random.normal(kq, (dim, 3 * inner_dim), jnp.float32),
        "w_out": 0.05 * jax.random.normal(ko, (inner_dim, dim), jnp.float32),
        "b_out": 0.05 * jax.random.normal(kb, (dim,), jnp.float32),
    }
    # text key-padding mask (True = attend), like the module's `mask` argument
    mask = jax.random.bernoulli(km, 0.8, (b, text_len))

    for axis in (0, 1):
        out = sparse_axial_causal_attention(
            x, params, heads=heads, dim_head=dim_head, image_size=image_size,
            seq_len=seq_len, axis=axis, mask=mask)
        out = jax.block_until_ready(out)
        ref = reference_forward(
            x, params, heads=heads, dim_head=dim_head, image_size=image_size,
            seq_len=seq_len, axis=axis, mask=mask)
        assert out.shape == (b, n, dim), out.shape
        # bf16 MXU operands + approx reciprocal -> looser tolerance vs f32 ref
        np.testing.assert_allclose(np.asarray(out), np.asarray(ref),
                                   rtol=2e-2, atol=2e-2)

    print("KERNEL_OK")
</pallas_src>

<mosaic_0001>
module attributes {stable_mosaic.version = 11 : i64} {
  func.func @_linear_kernel(%arg0: i32, %arg1: i32, %arg2: i32, %arg3: memref<48x32xbf16, #tpu.memory_space<vmem>>, %arg4: memref<32x32xbf16, #tpu.memory_space<vmem>>, %arg5: memref<1x32xf32, #tpu.memory_space<vmem>>, %arg6: memref<48x32xbf16, #tpu.memory_space<vmem>>, %arg7: memref<48x32xf32, #tpu.memory_space<vmem>>) attributes {dimension_semantics = [#tpu.dimension_semantics<parallel>, #tpu.dimension_semantics<parallel>, #tpu.dimension_semantics<arbitrary>], iteration_bounds = array<i64: 1, 1, 1>, scalar_prefetch = 0 : i64, scratch_operands = 1 : i64, tpu.core_type = #tpu.core_type<tc>, window_params = [{transform_indices = @transform_0, window_bounds = array<i64: 48, 32>}, {transform_indices = @transform_1, window_bounds = array<i64: 32, 32>}, {transform_indices = @transform_2, window_bounds = array<i64: 1, 32>}, {transform_indices = @transform_3, window_bounds = array<i64: 48, 32>}]} {
    %c0_i32 = arith.constant 0 : i32
    %0 = arith.cmpi eq, %arg2, %c0_i32 : i32
    %1 = arith.extui %0 : i1 to i32
    %c0_i32_0 = arith.constant 0 : i32
    %2 = arith.cmpi ne, %1, %c0_i32_0 : i32
    scf.if %2 {
      %cst_10 = arith.constant 0.000000e+00 : f32
      %12 = vector.broadcast %cst_10 : f32 to vector<48x32xf32>
      %c0_11 = arith.constant 0 : index
      %c0_12 = arith.constant 0 : index
      %13 = vector.load %arg7[%c0_11, %c0_12] : memref<48x32xf32, #tpu.memory_space<vmem>>, vector<48x32xf32>
      tpu.vector_store %arg7[%c0_11, %c0_12], %12 {strides = array<i32>} : memref<48x32xf32, #tpu.memory_space<vmem>>, vector<48x32xf32>,
    } else {
    }
    %c0 = arith.constant 0 : index
    %c0_1 = arith.constant 0 : index
    %3 = vector.load %arg7[%c0, %c0_1] : memref<48x32xf32, #tpu.memory_space<vmem>>, vector<48x32xf32>
    %c0_2 = arith.constant 0 : index
    %c0_3 = arith.constant 0 : index
    %4 = vector.load %arg3[%c0_2, %c0_3] : memref<48x32xbf16, #tpu.memory_space<vmem>>, vector<48x32xbf16>
    %c0_4 = arith.constant 0 : index
    %c0_5 = arith.constant 0 : index
    %5 = vector.load %arg4[%c0_4, %c0_5] : memref<32x32xbf16, #tpu.memory_space<vmem>>, vector<32x32xbf16>
    %cst = arith.constant dense<0.000000e+00> : vector<48x32xf32>
    %6 = tpu.matmul %4, %5, %cst {dimension_numbers = #tpu.dot_dimension_numbers<[1], [0], [0], [1], [0, 0, 1, 1], [], []>} : vector<48x32xbf16>, vector<32x32xbf16>, vector<48x32xf32> -> vector<48x32xf32>
    %7 = arith.addf %3, %6 : vector<48x32xf32>
    %c0_6 = arith.constant 0 : index
    %c0_7 = arith.constant 0 : index
    %8 = vector.load %arg7[%c0_6, %c0_7] : memref<48x32xf32, #tpu.memory_space<vmem>>, vector<48x32xf32>
    tpu.vector_store %arg7[%c0_6, %c0_7], %7 {strides = array<i32>} : memref<48x32xf32, #tpu.memory_space<vmem>>, vector<48x32xf32>,
    %c0_i32_8 = arith.constant 0 : i32
    %9 = arith.cmpi eq, %arg2, %c0_i32_8 : i32
    %10 = arith.extui %9 : i1 to i32
    %c0_i32_9 = arith.constant 0 : i32
    %11 = arith.cmpi ne, %10, %c0_i32_9 : i32
    scf.if %11 {
      %c0_10 = arith.constant 0 : index
      %c0_11 = arith.constant 0 : index
      %12 = vector.load %arg7[%c0_10, %c0_11] : memref<48x32xf32, #tpu.memory_space<vmem>>, vector<48x32xf32>
      %c0_12 = arith.constant 0 : index
      %c0_13 = arith.constant 0 : index
      %13 = vector.load %arg5[%c0_12, %c0_13] : memref<1x32xf32, #tpu.memory_space<vmem>>, vector<1x32xf32>
      %14 = vector.broadcast %13 : vector<1x32xf32> to vector<48x32xf32>
      %15 = arith.addf %12, %14 : vector<48x32xf32>
      %16 = arith.truncf %15 : vector<48x32xf32> to vector<48x32xbf16>
      %c0_14 = arith.constant 0 : index
      %c0_15 = arith.constant 0 : index
      %17 = vector.load %arg6[%c0_14, %c0_15] : memref<48x32xbf16, #tpu.memory_space<vmem>>, vector<48x32xbf16>
      tpu.vector_store %arg6[%c0_14, %c0_15], %16 {strides = array<i32>} : memref<48x32xbf16, #tpu.memory_space<vmem>>, vector<48x32xbf16>,
    } else {
    }
    return
  }
  func.func @transform_0(%arg0: i32, %arg1: i32, %arg2: i32) -> (i32, i32) {
    %c0_i32 = arith.constant 0 : i32
    return %arg0, %arg2 : i32, i32
  }
  func.func @transform_1(%arg0: i32, %arg1: i32, %arg2: i32) -> (i32, i32) {
    %c0_i32 = arith.constant 0 : i32
    return %arg2, %arg1 : i32, i32
  }
  func.func @transform_2(%arg0: i32, %arg1: i32, %arg2: i32) -> (i32, i32) {
    %c0_i32 = arith.constant 0 : i32
    %c0_i32_0 = arith.constant 0 : i32
    return %c0_i32, %arg1 : i32, i32
  }
  func.func @transform_3(%arg0: i32, %arg1: i32, %arg2: i32) -> (i32, i32) {
    %c0_i32 = arith.constant 0 : i32
    return %arg0, %arg1 : i32, i32
  }
}

</mosaic_0001>

<bundles_post_ra>
// kernel: tpu_custom_call.1
= control target key start
LH: loop header
LB: loop body
LE: loop exit
PB: predicated region body
PF: predicated region fallthrough
CT: control target
= control target key end

     0   :  { %8 = vsyncpa [#allocation4], 0  ;;  %s525_s0 = inlined_call_operand.hbm [shape: bf16[48,32], index: 0, kind: input, shape index: {}]   ;;  %s526_s1 = inlined_call_operand.hbm [shape: bf16[32,32], index: 1, kind: input, shape index: {}]   ;;  %s527_s2 = inlined_call_operand.hbm [shape: f32[1,32], index: 2, kind: input, shape index: {}]   ;;  %s528_s3 = inlined_call_operand.hbm [shape: bf16[48,32], index: 3, kind: output, shape index: {}]  }
   0x1   :  { %9 = vsyncpa [#allocation7], 0 }
   0x2   :  { %10 = vsyncpa [#allocation5], 0  ;;  %s412_s12 = smov [#allocation6]   ;;  %s413_s14 = smov [#allocation3]  }
   0x3   :  { %s28_s13 = sshll.u32 %s412_s12, 4  ;;  %s16_s15 = sshll.u32 %s413_s14, 4  ;;  %s29_s13 = int_to_ptr.vmem [resolvable:$true] %s28_s13  ;;  %s440_s15 = int_to_ptr.vmem [resolvable:$true] %s16_s15 }
   0x4   :  { %s318_s18 = scalar_lea.hbm %s526_s1, 256 }
   0x5   :  { %p319_p0 = scmp.ne.s32.totalorder %s526_s1, %s318_s18  ;;  %p322_p1 = scmp.lt.u32.totalorder %s318_s18, %s526_s1 }
   0x7   :  { %p324_p2 = pnand %p322_p1, %p319_p0 }
   0x9   :  { %327 = shalt.err (!%p324_p2)
}
   0xa   :  { %s328_s23 = scalar_lea.vmem %s29_s13, 256  ;;  %p333_p4 = scmp.lt.s32.totalorder %s29_s13, %s29_s13 }
   0xb   :  { %p329_p3 = scmp.ne.s32.totalorder %s29_s13, %s328_s23  ;;  %p334_p5 = scmp.lt.s32.totalorder %s328_s23, %s328_s23 }
   0xd   :  { %p335_p6 = por %p334_p5, %p333_p4 }
   0xf   :  { %p336_p7 = pnand %p335_p6, %p329_p3 }
  0x11   :  { %339 = shalt.err (!%p336_p7)
}
  0x12   :  { %s414_s24 = smov 64   ;;  %s415_s25 = smov 4  }
  0x13   :  { %34 = dma.hbm_to_vmem [thread:$0]  %s526_s1, 256, %s29_s13, [#allocation7], %s414_s24, %s414_s24, %s415_s25  }
  0x14   :  { %s340_s30 = scalar_lea.hbm %s525_s0, 384 }
  0x15   :  { %p341_p8 = scmp.ne.s32.totalorder %s525_s0, %s340_s30  ;;  %p344_p9 = scmp.lt.u32.totalorder %s340_s30, %s525_s0 }
  0x17   :  { %p346_p10 = pnand %p344_p9, %p341_p8 }
  0x19   :  { %349 = shalt.err (!%p346_p10)
}
  0x1a   :  { %s350_s8 = scalar_lea.vmem %s440_s15, 384  ;;  %p355_p12 = scmp.lt.s32.totalorder %s440_s15, %s440_s15 }
  0x1b   :  { %p351_p11 = scmp.ne.s32.totalorder %s440_s15, %s350_s8  ;;  %p356_p13 = scmp.lt.s32.totalorder %s350_s8, %s350_s8 }
  0x1d   :  { %p357_p0 = por %p356_p13, %p355_p12 }
  0x1f   :  { %p358_p1 = pnand %p357_p0, %p351_p11 }
  0x21   :  { %361 = shalt.err (!%p358_p1)
}
  0x22   :  { %22 = dma.hbm_to_vmem [thread:$0]  %s525_s0, 384, %s440_s15, [#allocation4], %s414_s24, %s414_s24, %s415_s25  }
  0x23   :  { %s416_s10 = smov [#allocation8]   ;;  %s362_s14 = scalar_lea.hbm %s527_s2, 16 }
  0x24   :  { %s41_s11 = sshll.u32 %s416_s10, 4  ;;  %p363_p2 = scmp.ne.s32.totalorder %s527_s2, %s362_s14  ;;  %s42_s11 = int_to_ptr.vmem [resolvable:$true] %s41_s11 }
  0x25   :  { %p366_p3 = scmp.lt.u32.totalorder %s362_s14, %s527_s2 }
  0x27   :  { %p368_p4 = pnand %p366_p3, %p363_p2 }
  0x29   :  { %371 = shalt.err (!%p368_p4)
}
  0x2a   :  { %s372_s20 = scalar_lea.vmem %s42_s11, 16  ;;  %s376_s0 = scalar_lea.vmem %s42_s11, 32 }
  0x2b   :  { %p373_p5 = scmp.ne.s32.totalorder %s42_s11, %s372_s20  ;;  %p377_p6 = scmp.lt.s32.totalorder %s42_s11, %s42_s11 }
  0x2c   :  { %p378_p7 = scmp.lt.s32.totalorder %s376_s0, %s372_s20 }
  0x2e   :  { %p379_p8 = por %p378_p7, %p377_p6 }
  0x30   :  { %p380_p9 = pnand %p379_p8, %p373_p5 }
  0x32   :  { %383 = shalt.err (!%p380_p9)
}
  0x33   :  { %44 = dma.hbm_to_vmem [thread:$0]  %s527_s2, 16, %s42_s11, [#allocation7]  }
  0x34   :  { %406 = dma.done.wait [#allocation4], 384  }
  0x35   :  { %407 = vsyncadd [#allocation4], 4294966912 }
  0x36   :  { %408 = dma.done.wait [#allocation7], 272  }
  0x37   :  { %409 = vsyncadd [#allocation7], 4294967024  ;;  %vm59_vm0 = vcmask 261120   ;;  %v417_v0 = vmov 0.0   ;;  %vm418_vm1 = vmmov 0   ;;  %v313_v1 = vld [vmem:[#allocation6] sm:$0xff]  }
  0x38   :  { %301 = vmatprep.subr.bf16.mxu1 %v417_v0  ;;  %285 = vmatprep.subr.bf16.mxu0 %v417_v0  ;;  %60 = vst.msk [vmem:[#allocation2] sm:$0xff] %vm59_vm0, %v417_v0  ;;  %61 = vst.msk [vmem:[#allocation2 + $0x8] sm:$0xff] %vm59_vm0, %v417_v0  ;;  %v314_v2 = vld [vmem:[#allocation6 + $0x8] sm:$0xff]   ;;  %v315_v3 = vld [vmem:[#allocation3 + $0x8] sm:$0xff]   ;;  %vm234_vm2 = vcmask 257024   ;;  %s419_s2 = smov [#allocation9]  }
  0x39   :  { %62 = vst.msk [vmem:[#allocation2 + $0x10] sm:$0xff] %vm59_vm0, %v417_v0  ;;  %63 = vst.msk [vmem:[#allocation2 + $0x18] sm:$0xff] %vm59_vm0, %v417_v0  ;;  %293 = vmatprep.mubr.msk.bf16.mxu1 %vm418_vm1, %v417_v0  ;;  %289 = vmatprep.mubr.msk.bf16.mxu0 %vm418_vm1, %v417_v0  ;;  %v316_v4 = vld [vmem:[#allocation3] sm:$0xff]   ;;  %v317_v5 = vld [vmem:[#allocation3 + $0x10] sm:$0xff]   ;;  %s246_s22 = sshll.u32 %s419_s2, 4  ;;  %s247_s22 = int_to_ptr.vmem [resolvable:$true] %s246_s22 }
  0x3a   :  { %64 = vst.msk [vmem:[#allocation2 + $0x20] sm:$0xff] %vm59_vm0, %v417_v0  ;;  %65 = vst.msk [vmem:[#allocation2 + $0x28] sm:$0xff] %vm59_vm0, %v417_v0  ;;  %303 = vmatpush3.bf16.msra.mxu1 %v313_v1  ;;  %286 = vmatpush3.bf16.msra.mxu0 %v313_v1  ;;  %v267_v25 = vld [vmem:[#allocation8] ss:$0 sm:$0xff]  ;;  %s384_s23 = scalar_lea.vmem %s247_s22, 384  ;;  %p389_p11 = scmp.lt.s32.totalorder %s247_s22, %s247_s22 }
  0x3b   :  { %302 = vmatprep.subr.bf16.mxu1 %v417_v0  ;;  %287 = vmatprep.subr.bf16.mxu0 %v417_v0  ;;  %p385_p10 = scmp.ne.s32.totalorder %s247_s22, %s384_s23  ;;  %p390_p12 = scmp.lt.s32.totalorder %s384_s23, %s384_s23 }
  0x3d   :  { %p391_p13 = por %p390_p12, %p389_p11 }
  0x3e   :  { %304 = vmatpush3.bf16.msra.mxu1 %v314_v2  ;;  %288 = vmatpush3.bf16.msra.mxu0 %v314_v2 }
  0x3f   :  { %v66_v7 = vld [vmem:[#allocation2] sm:$0xff]  ;;  %v67_v11 = vld [vmem:[#allocation2 + $0x8] sm:$0xff]  ;;  %p392_p0 = pnand %p391_p13, %p385_p10 }
  0x40   :  { %v68_v6 = vld [vmem:[#allocation2 + $0x10] sm:$0xff]  ;;  %v69_v9 = vld [vmem:[#allocation2 + $0x18] sm:$0xff] }
  0x41   :  { %294 = vmatmul.mubr.msk.bf16.vlgmr.msra.gmra.mrb[0].mxu1 %vm59_vm0, %v315_v3  ;;  %290 = vmatmul.mubr.msk.bf16.vlgmr.msra.gmra.mrb[0].mxu0 %vm59_vm0, %v316_v4  ;;  %v70_v22 = vld [vmem:[#allocation2 + $0x20] sm:$0xff]  ;;  %v71_v24 = vld [vmem:[#allocation2 + $0x28] sm:$0xff] }
  0x42   :  { %297 = vmatprep.mubr.msk.bf16.mxu1 %vm418_vm1, %v417_v0 }
  0x49   :  { %298 = vmatmul.mubr.msk.bf16.gmra.mrb[4].mxu1 %vm59_vm0, %v317_v5 }
 0x114   :  { %v161_v8 = vpop.f32.mrb[0].mxu1  ;;  %v153_v10 = vpop.f32.mrb[0].mxu0 }
 0x115   :  { %v178_v12 = vadd.f32 %v161_v8, %v68_v6  ;;  %v295_v13 = vpop.f32.mrb[1].mxu1  ;;  %v176_v14 = vadd.f32 %v153_v10, %v66_v7  ;;  %v291_v15 = vpop.f32.mrb[1].mxu0 }
 0x116   :  { %v164_v16 = vpop.f32.mrb[2].mxu1  ;;  %v156_v17 = vpop.f32.mrb[2].mxu0 }
 0x117   :  { %184 = vst.msk [vmem:[#allocation2 + $0x10] sm:$0xff] %vm59_vm0, %v178_v12  ;;  %v179_v18 = vadd.f32 %v164_v16, %v69_v9  ;;  %v296_v19 = vpop.f32.mrb[3].mxu1  ;;  %182 = vst.msk [vmem:[#allocation2] sm:$0xff] %vm59_vm0, %v176_v14  ;;  %v177_v20 = vadd.f32 %v156_v17, %v67_v11  ;;  %v292_v21 = vpop.f32.mrb[3].mxu0 }
 0x119   :  { %185 = vst.msk [vmem:[#allocation2 + $0x18] sm:$0xff] %vm59_vm0, %v179_v18  ;;  %183 = vst.msk [vmem:[#allocation2 + $0x8] sm:$0xff] %vm59_vm0, %v177_v20 }
 0x11c   :  { %v169_v23 = vpop.f32.mrb[4].mxu1 }
 0x11d   :  { %v180_v26 = vadd.f32 %v169_v23, %v70_v22  ;;  %v299_v27 = vpop.f32.mrb[5].mxu1 }
 0x11e   :  { %v172_v28 = vpop.f32.mrb[6].mxu1  ;;  %v191_v29 = vld [vmem:[#allocation2] sm:$0xff]  ;;  %v193_v30 = vld [vmem:[#allocation2 + $0x10] sm:$0xff] }
 0x11f   :  { %186 = vst.msk [vmem:[#allocation2 + $0x20] sm:$0xff] %vm59_vm0, %v180_v26  ;;  %v181_v31 = vadd.f32 %v172_v28, %v71_v24  ;;  %v300_v32 = vpop.f32.mrb[7].mxu1  ;;  %v204_v33 = vadd.f32 %v267_v25, %v191_v29  ;;  %v206_v34 = vadd.f32 %v267_v25, %v193_v30 }
 0x120   :  { %v192_v35 = vld [vmem:[#allocation2 + $0x8] sm:$0xff]  ;;  %v194_v36 = vld [vmem:[#allocation2 + $0x18] sm:$0xff] }
 0x121   :  { %187 = vst.msk [vmem:[#allocation2 + $0x28] sm:$0xff] %vm59_vm0, %v181_v31  ;;  %v205_v37 = vadd.f32 %v267_v25, %v192_v35  ;;  %v207_v38 = vadd.f32 %v267_v25, %v194_v36  ;;  %v274_v39 = vpack.c.bf16 %v204_v33, %v204_v33  ;;  %v276_v40 = vpack.c.bf16 %v206_v34, %v206_v34 }
 0x123   :  { %v275_v41 = vpack.c.bf16 %v205_v37, %v205_v37  ;;  %v277_v42 = vpack.c.bf16 %v207_v38, %v207_v38  ;;  %235 = vst.msk [vmem:[#allocation9] sm:$0xf] %vm234_vm2, %v274_v39  ;;  %237 = vst.msk [vmem:[#allocation9 + $0x8] sm:$0xf] %vm234_vm2, %v276_v40 }
 0x125   :  { %236 = vst.msk [vmem:[#allocation9 + $0x4] sm:$0xf] %vm234_vm2, %v275_v41  ;;  %238 = vst.msk [vmem:[#allocation9 + $0xc] sm:$0xf] %vm234_vm2, %v277_v42 }
 0x126   :  { %v195_v43 = vld [vmem:[#allocation2 + $0x20] sm:$0xff] }
 0x127   :  { %v208_v44 = vadd.f32 %v267_v25, %v195_v43 }
 0x128   :  { %v196_v45 = vld [vmem:[#allocation2 + $0x28] sm:$0xff] }
 0x129   :  { %v209_v46 = vadd.f32 %v267_v25, %v196_v45  ;;  %v278_v47 = vpack.c.bf16 %v208_v44, %v208_v44 }
 0x12b   :  { %v279_v48 = vpack.c.bf16 %v209_v46, %v209_v46  ;;  %239 = vst.msk [vmem:[#allocation9 + $0x10] sm:$0xf] %vm234_vm2, %v278_v47 }
 0x12d   :  { %240 = vst.msk [vmem:[#allocation9 + $0x14] sm:$0xf] %vm234_vm2, %v279_v48 }
 0x12e   :  { %395 = shalt.err (!%p392_p0)
}
 0x12f   :  { %s396_s28 = scalar_lea.hbm %s528_s3, 384 }
 0x130   :  { %p397_p1 = scmp.ne.s32.totalorder %s528_s3, %s396_s28  ;;  %p400_p2 = scmp.lt.u32.totalorder %s396_s28, %s528_s3 }
 0x132   :  { %p402_p3 = pnand %p400_p2, %p397_p1 }
 0x134   :  { %405 = shalt.err (!%p402_p3)
}
 0x135   :  { %252 = dma.vmem_to_hbm [thread:$0]  %s247_s22, 384, %s528_s3, [#allocation5], %s414_s24, %s414_s24, %s415_s25  }
 0x136   :  { %410 = dma.done.wait [#allocation5], 384  }
 0x137   :  { %411 = vsyncadd [#allocation5], 4294966912 }
 0x138   :  { %256 = vsyncpa [#allocation4], 1 }
 0x139   :  { %257 = vsyncpa [#allocation7], 1 }
 0x13a   :  { %258 = vsyncpa [#allocation5], 1 }

</bundles_post_ra>
